<compile_context>
chip_gen: v7x
topology: tpu7x:2x2x1
jax: 0.10.0
libtpu: 0.0.40
codegen_flags: <defaults>
</compile_context>

<pallas_src>
import jax
import jax.numpy as jnp
from jax.experimental import pallas as pl
from jax.experimental.pallas import tpu as pltpu

NEG_SLOPE = 0.2     # GATConv default negative_slope
NEG_BIG = -1e30     # finite "minus infinity": keeps online softmax NaN-free


def _round_up(x, m):
    return (x + m - 1) // m * m


# ----------------------------------------------------------------- projection
def _proj_kernel(x_ref, w_ref, amat_ref, val_ref, logit_ref):
    # xw in f32 (bf16 MXU inputs, f32 accumulation)
    xw = jnp.dot(x_ref[...], w_ref[...], preferred_element_type=jnp.float32)
    # bf16 values in the exact layout the attention kernel consumes
    val_ref[...] = xw.astype(jnp.bfloat16)
    # per-node, per-head attention logits: [dst logits | src logits]
    logit_ref[...] = jnp.dot(xw, amat_ref[...],
                             preferred_element_type=jnp.float32)


def _project(x_bf16, w_bf16, amat_f32, *, tile):
    n_pad, din = x_bf16.shape
    hc = w_bf16.shape[1]
    h2 = amat_f32.shape[1]
    return pl.pallas_call(
        _proj_kernel,
        out_shape=(jax.ShapeDtypeStruct((n_pad, hc), jnp.bfloat16),
                   jax.ShapeDtypeStruct((n_pad, h2), jnp.float32)),
        grid_spec=pltpu.PrefetchScalarGridSpec(
            num_scalar_prefetch=0,
            grid=(n_pad // tile,),
            in_specs=[pl.BlockSpec((tile, din), lambda i: (i, 0)),
                      pl.BlockSpec((din, hc), lambda i: (0, 0)),
                      pl.BlockSpec((hc, h2), lambda i: (0, 0))],
            out_specs=[pl.BlockSpec((tile, hc), lambda i: (i, 0)),
                       pl.BlockSpec((tile, h2), lambda i: (i, 0))],
        ),
        compiler_params=pltpu.CompilerParams(
            dimension_semantics=("parallel",)),
    )(x_bf16, w_bf16, amat_f32)


# ------------------------------------------------------------------ attention
def _make_attn_kernel(heads, c):
    def kernel(nnz_ref, adj_ref, adst_ref, asrc_ref, val_ref, bias_ref,
               out_ref, m_sc, l_sc, acc_sc):
        i = pl.program_id(0)
        j = pl.program_id(1)
        nj = pl.num_programs(1)

        @pl.when(j == 0)
        def _():
            m_sc[...] = jnp.full_like(m_sc, NEG_BIG)
            l_sc[...] = jnp.zeros_like(l_sc)
            acc_sc[...] = jnp.zeros_like(acc_sc)

        # Skip all softmax work for fully-masked (row, col) blocks.
        @pl.when(nnz_ref[i * nj + j] > 0)
        def _():
            mask = adj_ref[...] > 0                       # (TM, TN), all heads
            for h in range(heads):                        # heads folded in-kernel
                lo = h * c
                d = adst_ref[:, h:h + 1]                  # (TM, 1)
                s = asrc_ref[h:h + 1, :]                  # (1, TN)
                e = d + s
                e = jnp.where(e > 0.0, e, NEG_SLOPE * e)  # LeakyReLU
                e = jnp.where(mask, e, NEG_BIG)

                m_prev = m_sc[:, h:h + 1]
                m_new = jnp.maximum(m_prev, jnp.max(e, axis=-1, keepdims=True))
                corr = jnp.exp(m_prev - m_new)
                # explicit re-mask: masked columns contribute exactly 0 even
                # before any real edge has been seen for a row.
                p = jnp.where(mask, jnp.exp(e - m_new), 0.0)

                l_new = corr * l_sc[:, lo:lo + 1] + jnp.sum(p, axis=-1,
                                                            keepdims=True)
                l_sc[:, lo:lo + c] = jnp.broadcast_to(l_new,
                                                      (l_new.shape[0], c))
                acc_sc[:, lo:lo + c] = corr * acc_sc[:, lo:lo + c] + jnp.dot(
                    p.astype(jnp.bfloat16), val_ref[:, lo:lo + c],
                    preferred_element_type=jnp.float32)
                m_sc[:, h:h + 1] = m_new

        @pl.when(j == nj - 1)
        def _():
            # Every real row has at least its self loop (l > 0); padded rows
            # are guarded against 0 * inf and sliced off afterwards.
            inv_l = pl.reciprocal(jnp.maximum(l_sc[...], 1e-20), approx=True)
            out_ref[...] = jax.nn.sigmoid(acc_sc[...] * inv_l + bias_ref[...])

    return kernel


def gat_layer_forward(x, edge_index, edge_weight, params, *, heads, out_dim):
    """Pallas implementation of GATLayer.forward(x, edge_index, edge_weight)."""
    # TODO(synk): edge_weight unused — GATConv built without edge_dim ignores edge attrs.
    del edge_weight
    N = x.shape[0]
    H, C = heads, out_dim
    HC = H * C

    W = params["W"].astype(jnp.float32)
    a_src = params["a_src"].astype(jnp.float32)      # (H, C)
    a_dst = params["a_dst"].astype(jnp.float32)      # (H, C)
    bias = params["bias"].astype(jnp.float32)        # (HC,)

    # Tiling: one full-extent tile for small graphs; 256x512 tiles otherwise
    # (adj tile 128 KiB int8 + (tile_n, HC) bf16 values — far inside VMEM).
    if N <= 512:
        tile_m = tile_n = _round_up(N, 8)
    else:
        tile_m, tile_n = 256, 512
    n_pad = _round_up(N, max(tile_m, tile_n))
    grid_m = n_pad // tile_m
    grid_n = n_pad // tile_n

    # ---- fused projection: bf16 values [n_pad, HC] + per-node logits --------
    x_bf16 = jnp.pad(x.astype(jnp.bfloat16), ((0, n_pad - N), (0, 0)))
    eye_h = jnp.eye(H, dtype=jnp.float32)
    amat_dst = (eye_h[:, None, :] * a_dst[:, :, None]).reshape(HC, H)
    amat_src = (eye_h[:, None, :] * a_src[:, :, None]).reshape(HC, H)
    amat = jnp.concatenate([amat_dst, amat_src], axis=1)          # (HC, 2H)

    values, logits = _project(x_bf16, W.astype(jnp.bfloat16), amat, tile=tile_m)
    adst_nh = logits[:, :H]                                       # (n_pad, H)
    asrc_hn = logits[:, H:].T                                     # (H, n_pad) tiny

    # ---- dense int8 adjacency mask: adj[i, j] = 1 iff edge j -> i (+ loops) -
    src, dst = edge_index[0], edge_index[1]
    adj = jnp.zeros((n_pad, n_pad), jnp.int8).at[dst, src].set(1)
    diag = jnp.arange(N)
    adj = adj.at[diag, diag].set(1)                               # add_self_loops

    # Block-level nnz table (cheap block-sparsity guard), scalar-prefetched.
    nnz = jnp.zeros((grid_m, grid_n), jnp.int32)
    nnz = nnz.at[dst // tile_m, src // tile_n].add(1)
    nnz = nnz.at[diag // tile_m, diag // tile_n].add(1)
    nnz_flat = nnz.reshape(-1)

    bias_row = bias.reshape(1, HC)

    kernel = _make_attn_kernel(H, C)
    out_pad = pl.pallas_call(
        kernel,
        out_shape=jax.ShapeDtypeStruct((n_pad, HC), jnp.float32),
        grid_spec=pltpu.PrefetchScalarGridSpec(
            num_scalar_prefetch=1,
            grid=(grid_m, grid_n),
            in_specs=[
                pl.BlockSpec((tile_m, tile_n), lambda i, j, nnz: (i, j)),  # adj
                pl.BlockSpec((tile_m, H), lambda i, j, nnz: (i, 0)),       # dst logits
                pl.BlockSpec((H, tile_n), lambda i, j, nnz: (0, j)),       # src logits
                pl.BlockSpec((tile_n, HC), lambda i, j, nnz: (j, 0)),      # values bf16
                pl.BlockSpec((1, HC), lambda i, j, nnz: (0, 0)),           # bias
            ],
            out_specs=pl.BlockSpec((tile_m, HC), lambda i, j, nnz: (i, 0)),
            scratch_shapes=[
                pltpu.VMEM((tile_m, H), jnp.float32),    # running max (per head)
                pltpu.VMEM((tile_m, HC), jnp.float32),   # running denom (replicated)
                pltpu.VMEM((tile_m, HC), jnp.float32),   # running numerator
            ],
        ),
        compiler_params=pltpu.CompilerParams(
            dimension_semantics=("parallel", "arbitrary")),
    )(nnz_flat, adj, adst_nh, asrc_hn, values, bias_row)

    # TODO(synk): attention dropout (p=0.6) is training-only; eval forward omits it.
    return out_pad[:N]


def gat_reference(x, edge_index, params, *, heads, out_dim):
    """Pure-JAX f32 reference of the same math (eval-mode GATConv + sigmoid)."""
    N = x.shape[0]
    xw = x @ params["W"]
    xw_r = xw.reshape(N, heads, out_dim)
    a_s = jnp.einsum("nhc,hc->nh", xw_r, params["a_src"])
    a_d = jnp.einsum("nhc,hc->nh", xw_r, params["a_dst"])
    src, dst = edge_index[0], edge_index[1]
    adj = jnp.zeros((N, N), jnp.float32).at[dst, src].set(1.0)
    adj = adj.at[jnp.arange(N), jnp.arange(N)].set(1.0)
    outs = []
    for h in range(heads):
        e = a_d[:, h:h + 1] + a_s[:, h][None, :]
        e = jnp.where(e > 0.0, e, NEG_SLOPE * e)
        e = jnp.where(adj > 0.0, e, NEG_BIG)
        p = jax.nn.softmax(e, axis=-1)
        p = jnp.where(adj > 0.0, p, 0.0)
        outs.append(p @ xw_r[:, h, :])
    return jax.nn.sigmoid(jnp.concatenate(outs, axis=-1) + params["bias"])


if __name__ == "__main__":
    N, DIN, DOUT, HEADS, E = 8, 16, 8, 4, 20
    HC = HEADS * DOUT

    key = jax.random.PRNGKey(0)
    kw, ks, kd, kx, kei, kew = jax.random.split(key, 6)

    glorot_w = (6.0 / (DIN + HC)) ** 0.5
    glorot_a = (6.0 / (DOUT + 1)) ** 0.5
    params = {
        "W": jax.random.uniform(kw, (DIN, HC), jnp.float32, -glorot_w, glorot_w),
        "a_src": jax.random.uniform(ks, (HEADS, DOUT), jnp.float32, -glorot_a, glorot_a),
        "a_dst": jax.random.uniform(kd, (HEADS, DOUT), jnp.float32, -glorot_a, glorot_a),
        "bias": jnp.zeros((HC,), jnp.float32),
    }

    x = jax.random.normal(kx, (N, DIN), jnp.float32)
    edge_index = jax.random.randint(kei, (2, E), 0, N)
    edge_weight = jax.random.uniform(kew, (E,), jnp.float32)   # accepted but unused

    out = gat_layer_forward(x, edge_index, edge_weight, params,
                            heads=HEADS, out_dim=DOUT)
    out = jax.block_until_ready(out)

    ref = gat_reference(x, edge_index, params, heads=HEADS, out_dim=DOUT)
    assert out.shape == (N, HC), out.shape
    max_err = float(jnp.max(jnp.abs(out - ref)))
    assert jnp.allclose(out, ref, atol=5e-3), max_err   # bf16 MXU inputs, f32 accum

    print("KERNEL_OK")
</pallas_src>

<mosaic_0001>
module attributes {stable_mosaic.version = 11 : i64} {
  func.func @_proj_kernel(%arg0: i32, %arg1: memref<8x16xbf16, #tpu.memory_space<vmem>>, %arg2: memref<16x32xbf16, #tpu.memory_space<vmem>>, %arg3: memref<32x8xf32, #tpu.memory_space<vmem>>, %arg4: memref<8x32xbf16, #tpu.memory_space<vmem>>, %arg5: memref<8x8xf32, #tpu.memory_space<vmem>>) attributes {dimension_semantics = [#tpu.dimension_semantics<parallel>], iteration_bounds = array<i64: 1>, scalar_prefetch = 0 : i64, scratch_operands = 0 : i64, tpu.core_type = #tpu.core_type<tc>, window_params = [{transform_indices = @transform_0, window_bounds = array<i64: 8, 16>}, {pipeline_mode = #tpu.pipeline_mode<synchronous>, transform_indices = @transform_1, window_bounds = array<i64: 16, 32>}, {pipeline_mode = #tpu.pipeline_mode<synchronous>, transform_indices = @transform_2, window_bounds = array<i64: 32, 8>}, {transform_indices = @transform_3, window_bounds = array<i64: 8, 32>}, {transform_indices = @transform_4, window_bounds = array<i64: 8, 8>}]} {
    %c0 = arith.constant 0 : index
    %c0_0 = arith.constant 0 : index
    %0 = vector.load %arg1[%c0, %c0_0] : memref<8x16xbf16, #tpu.memory_space<vmem>>, vector<8x16xbf16>
    %c0_1 = arith.constant 0 : index
    %c0_2 = arith.constant 0 : index
    %1 = vector.load %arg2[%c0_1, %c0_2] : memref<16x32xbf16, #tpu.memory_space<vmem>>, vector<16x32xbf16>
    %cst = arith.constant dense<0.000000e+00> : vector<8x32xf32>
    %2 = tpu.matmul %0, %1, %cst {dimension_numbers = #tpu.dot_dimension_numbers<[1], [0], [0], [1], [0, 0, 1, 1], [], []>} : vector<8x16xbf16>, vector<16x32xbf16>, vector<8x32xf32> -> vector<8x32xf32>
    %3 = arith.truncf %2 : vector<8x32xf32> to vector<8x32xbf16>
    %c0_3 = arith.constant 0 : index
    %c0_4 = arith.constant 0 : index
    %4 = vector.load %arg4[%c0_3, %c0_4] : memref<8x32xbf16, #tpu.memory_space<vmem>>, vector<8x32xbf16>
    tpu.vector_store %arg4[%c0_3, %c0_4], %3 {strides = array<i32>} : memref<8x32xbf16, #tpu.memory_space<vmem>>, vector<8x32xbf16>,
    %c0_5 = arith.constant 0 : index
    %c0_6 = arith.constant 0 : index
    %5 = vector.load %arg3[%c0_5, %c0_6] : memref<32x8xf32, #tpu.memory_space<vmem>>, vector<32x8xf32>
    %cst_7 = arith.constant dense<0.000000e+00> : vector<8x8xf32>
    %6 = tpu.matmul %2, %5, %cst_7 {dimension_numbers = #tpu.dot_dimension_numbers<[1], [0], [0], [1], [0, 0, 1, 1], [], []>} : vector<8x32xf32>, vector<32x8xf32>, vector<8x8xf32> -> vector<8x8xf32>
    %c0_8 = arith.constant 0 : index
    %c0_9 = arith.constant 0 : index
    %7 = vector.load %arg5[%c0_8, %c0_9] : memref<8x8xf32, #tpu.memory_space<vmem>>, vector<8x8xf32>
    tpu.vector_store %arg5[%c0_8, %c0_9], %6 {strides = array<i32>} : memref<8x8xf32, #tpu.memory_space<vmem>>, vector<8x8xf32>,
    return
  }
  func.func @transform_0(%arg0: i32) -> (i32, i32) {
    %c0_i32 = arith.constant 0 : i32
    %c0_i32_0 = arith.constant 0 : i32
    return %arg0, %c0_i32 : i32, i32
  }
  func.func @transform_1(%arg0: i32) -> (i32, i32) {
    %c0_i32 = arith.constant 0 : i32
    %c0_i32_0 = arith.constant 0 : i32
    %c0_i32_1 = arith.constant 0 : i32
    return %c0_i32, %c0_i32_0 : i32, i32
  }
  func.func @transform_2(%arg0: i32) -> (i32, i32) {
    %c0_i32 = arith.constant 0 : i32
    %c0_i32_0 = arith.constant 0 : i32
    %c0_i32_1 = arith.constant 0 : i32
    return %c0_i32, %c0_i32_0 : i32, i32
  }
  func.func @transform_3(%arg0: i32) -> (i32, i32) {
    %c0_i32 = arith.constant 0 : i32
    %c0_i32_0 = arith.constant 0 : i32
    return %arg0, %c0_i32 : i32, i32
  }
  func.func @transform_4(%arg0: i32) -> (i32, i32) {
    %c0_i32 = arith.constant 0 : i32
    %c0_i32_0 = arith.constant 0 : i32
    return %arg0, %c0_i32 : i32, i32
  }
}

</mosaic_0001>

<bundles_post_ra>
// kernel: tpu_custom_call.1
= control target key start
LH: loop header
LB: loop body
LE: loop exit
PB: predicated region body
PF: predicated region fallthrough
CT: control target
= control target key end

     0   :  { %10 = vsyncpa [#allocation3], 0  ;;  %v270_v1 = vmov 0.0   ;;  %vm271_vm0 = vmmov 0   ;;  %vm28_vm1 = vcmask 130048   ;;  %v272_v7 = vmov 0.0|0.0   ;;  %s342_s0 = inlined_call_operand.vmem [shape: bf16[8,16], index: 0, kind: input, shape index: {}]   ;;  %s343_s1 = inlined_call_operand.vmem [shape: bf16[16,32], index: 1, kind: input, shape index: {}]   ;;  %s344_s2 = inlined_call_operand.vmem [shape: f32[32,8], index: 2, kind: input, shape index: {}]   ;;  %s345_s3 = inlined_call_operand.hbm [shape: bf16[8,32], index: 3, kind: output, shape index: {0}]   ;;  %s346_s4 = inlined_call_operand.hbm [shape: f32[8,8], index: 4, kind: output, shape index: {1}]  }
   0x1   :  { %v221_v0 = vld [vmem:[%s343_s1] sm:$0xff]   ;;  %193 = vmatprep.subr.bf16.mxu0 %v270_v1  ;;  %195 = vmatprep.mubr.msk.bf16.mxu0 %vm271_vm0, %v270_v1  ;;  %v76_v4 = vld [vmem:[%s344_s2 + $0x8] sm:$0xff]  ;;  %v77_v5 = vld [vmem:[%s344_s2 + $0x10] sm:$0xff] }
   0x2   :  { %v19_v2 = vld [vmem:[%s342_s0] sm:$0xf]  ;;  %194 = vmatpush3.bf16.msra.mxu0 %v221_v0  ;;  %v78_v6 = vld [vmem:[%s344_s2 + $0x18] sm:$0xff]  ;;  %210 = vmatprep.subr.bf16.mxu1 %v272_v7 }
   0x3   :  { %v75_v3 = vld [vmem:[%s344_s2] sm:$0xff]  ;;  %207 = vmatprep.mubr.msk.f32.mxu1 %vm271_vm0, %v270_v1 }
   0x4   :  { %v211_v8 = vpack.c.bf16 %v76_v4, %v75_v3 }
   0x5   :  { %11 = vsyncpa [#allocation5], 0  ;;  %196 = vmatmul.mubr.msk.bf16.vlgmr.msra.gmra.mrb[0].mxu0 %vm28_vm1, %v19_v2  ;;  %v214_v9 = vpack.c.bf16 %v78_v6, %v77_v5  ;;  %vm79_vm2 = vcmask 261120   ;;  %vm73_vm3 = vcmask 257024   ;;  %s273_s0 = smov [#allocation2]  }
   0x6   :  { %212 = vmatpush3.bf16.msra.mxu1 %v211_v8  ;;  %s161_s2 = sshll.u32 %s273_s0, 4  ;;  %s162_s2 = int_to_ptr.vmem [resolvable:$true] %s161_s2 }
   0x7   :  { %213 = vmatprep.subr.bf16.mxu1 %v272_v7  ;;  %s222_s26 = scalar_lea.vmem %s162_s2, 64  ;;  %p227_p1 = scmp.lt.s32.totalorder %s162_s2, %s162_s2 }
   0x8   :  { %p223_p0 = scmp.ne.s32.totalorder %s162_s2, %s222_s26  ;;  %p228_p2 = scmp.lt.s32.totalorder %s222_s26, %s222_s26 }
   0xa   :  { %215 = vmatpush3.bf16.msra.mxu1 %v214_v9  ;;  %p229_p3 = por %p228_p2, %p227_p1 }
   0xc   :  { %p230_p4 = pnand %p229_p3, %p223_p0 }
  0xd8   :  { %v66_v10 = vpop.f32.mrb[0].mxu0 }
  0xd9   :  { %v72_v11 = vpack.c.bf16 %v66_v10, %v66_v10  ;;  %v197_v12 = vpop.f32.mrb[1].mxu0  ;;  %208 = vmatmul.mubr.msk.f32.vlgmr.msra.gmra.mrb[0].mxu1 %vm79_vm2, %v66_v10 }
  0xda   :  { %v69_v13 = vpop.f32.mrb[2].mxu0 }
  0xdb   :  { %v198_v14 = vpop.f32.mrb[3].mxu0  ;;  %74 = vst.msk [vmem:[#allocation2] sm:$0xf] %vm73_vm3, %v72_v11 }
  0xdc   :  { %233 = shalt.err (!%p230_p4)
}
  0xdd   :  { %s234_s29 = scalar_lea.hbm %s345_s3, 64 }
  0xde   :  { %p235_p5 = scmp.ne.s32.totalorder %s345_s3, %s234_s29  ;;  %p238_p6 = scmp.lt.u32.totalorder %s234_s29, %s345_s3 }
  0xe0   :  { %p240_p7 = pnand %p238_p6, %p235_p5 }
  0xe2   :  { %243 = shalt.err (!%p240_p7)
}
  0xe3   :  { %164 = dma.vmem_to_hbm [thread:$0]  %s162_s2, 64, %s345_s3, [#allocation3]   ;;  %vm153_vm4 = vcmask 64512  }
  0xe4   :  { %s274_s10 = smov [#allocation4]  }
  0xe5   :  { %s171_s11 = sshll.u32 %s274_s10, 4  ;;  %s172_s11 = int_to_ptr.vmem [resolvable:$true] %s171_s11 }
  0xe6   :  { %s244_s12 = scalar_lea.vmem %s172_s11, 128  ;;  %p249_p9 = scmp.lt.s32.totalorder %s172_s11, %s172_s11 }
  0xe7   :  { %p245_p8 = scmp.ne.s32.totalorder %s172_s11, %s244_s12  ;;  %p250_p10 = scmp.lt.s32.totalorder %s244_s12, %s244_s12 }
  0xe9   :  { %p251_p11 = por %p250_p10, %p249_p9 }
  0xeb   :  { %p252_p12 = pnand %p251_p11, %p245_p8 }
 0x1ac   :  { %v149_v15 = vpop.f32.mrb[0].mxu1 }
 0x1ad   :  { %154 = vst.msk [vmem:[#allocation4] sm:$0xff] %vm153_vm4, %v149_v15  ;;  %v209_v16 = vpop.f32.mrb[1].mxu1 }
 0x1ae   :  { %255 = shalt.err (!%p252_p12)
}
 0x1af   :  { %s256_s15 = scalar_lea.hbm %s346_s4, 128 }
 0x1b0   :  { %p257_p13 = scmp.ne.s32.totalorder %s346_s4, %s256_s15  ;;  %p260_p0 = scmp.lt.u32.totalorder %s256_s15, %s346_s4 }
 0x1b2   :  { %p262_p1 = pnand %p260_p0, %p257_p13 }
 0x1b4   :  { %265 = shalt.err (!%p262_p1)
}
 0x1b5   :  { %174 = dma.vmem_to_hbm [thread:$0]  %s172_s11, 128, %s346_s4, [#allocation5]  }
 0x1b6   :  { %266 = dma.done.wait [#allocation3], 64  }
 0x1b7   :  { %267 = vsyncadd [#allocation3], 4294967232 }
 0x1b8   :  { %268 = dma.done.wait [#allocation5], 128  }
 0x1b9   :  { %269 = vsyncadd [#allocation5], 4294967168 }
 0x1ba   :  { %181 = vsyncpa [#allocation3], 1 }
 0x1bb   :  { %182 = vsyncpa [#allocation5], 1 }

</bundles_post_ra>
